<compile_context>
chip_gen: v6e
topology: v6e:2x2x1
jax: 0.10.0
libtpu: 0.0.40
codegen_flags: <defaults>
</compile_context>

<pallas_src>
import jax
import jax.numpy as jnp
from jax.experimental import pallas as pl
from jax.experimental.pallas import tpu as pltpu

C_FEAT = 64     # ENet(64) output channels
C_EMB = 3       # conv_embedding: 64 -> 3
C_LOGIT = 2     # conv_logit:     64 -> 2
HEADS_PAD = 8   # fused-head rows, padded to a full sublane group

TARGET_TILE_PIXELS = 16 * 1024           # pixels per row tile (VMEM sizing knob)
VMEM_LIMIT_BYTES = 48 * 1024 * 1024      # explicit budget; < 64 MiB physical on v7x


def lanenet_kernel(xc_ref, wf_ref, bf_ref, wh_ref, bh_ref, emb_ref, logit_ref):
    # xc_ref   : (1, 9*Cin, TW) bf16   channels-first im2col slab (TW pixels)
    # wf_ref   : (64, 9*Cin)    bf16   backbone 3x3 conv, contraction = tap*Cin + cin
    # bf_ref   : (64, 1)        f32
    # wh_ref   : (8, 64)        bf16   fused heads: [embedding(3); logit(2); zero-pad(3)]
    # bh_ref   : (8, 1)         f32
    # emb_ref  : (1, 3, TW)     f32
    # logit_ref: (1, 2, TW)     f32
    xc = xc_ref[0]                                              # (9*Cin, TW)

    # Backbone: one K=9*Cin MXU matmul, f32 accumulate, bias + ReLU on the VPU.
    acc = jnp.dot(wf_ref[...], xc, preferred_element_type=jnp.float32)
    feat = jnp.maximum(acc + bf_ref[...], 0.0)                  # (64, TW) f32

    # Fused 1x1 heads: one MXU pass over feat produces both embedding + logit.
    heads = jnp.dot(wh_ref[...], feat.astype(jnp.bfloat16),
                    preferred_element_type=jnp.float32)
    heads = heads + bh_ref[...]                                 # (8, TW) f32

    emb_ref[...] = heads[None, :C_EMB, :].astype(emb_ref.dtype)
    logit_ref[...] = heads[None, C_EMB:C_EMB + C_LOGIT, :].astype(logit_ref.dtype)


def _choose_tile_rows(H, W, N, target_pixels=TARGET_TILE_PIXELS):
    """Largest TH with H % TH == 0, (TH*W) % 128 == 0, TH*W <= target pixels,
    preferring >= 2 total grid steps (megacore sharding / pipelining)."""
    cands = [th for th in range(1, H + 1)
             if H % th == 0 and (th * W) % 128 == 0]
    if not cands:
        return H              # whole image: block dim == full dim is legal
    fits = [th for th in cands if th * W <= target_pixels]
    if not fits:
        return min(cands)
    multi = [th for th in fits if N * (H // th) >= 2]
    return max(multi) if multi else max(fits)


def lanenet_forward(x_nchw, params):
    """x_nchw: (N, Cin, H, W) float32. Returns (embedding, logit) in NCHW."""
    wf_t, bf, wl_t, bl, we_t, be = params
    N, Cin, H, W = x_nchw.shape
    K9 = 9 * Cin

    # ---- wrapper-side im2col (channels-first, pixels flattened & lane-dense) ----
    x_pad = jnp.pad(x_nchw, ((0, 0), (0, 0), (1, 1), (1, 1)))
    taps = [x_pad[:, :, dy:dy + H, dx:dx + W]
            for dy in range(3) for dx in range(3)]              # 9 x (N, Cin, H, W)
    x_col = jnp.concatenate(taps, axis=1)                       # (N, 9*Cin, H, W)
    x_col = x_col.reshape(N, K9, H * W).astype(jnp.bfloat16)

    # ---- weight re-layout ----
    # (Cout, Cin, 3, 3) -> (Cout, 9*Cin), contraction index = (dy*3+dx)*Cin + cin.
    wf = jnp.transpose(wf_t, (0, 2, 3, 1)).reshape(C_FEAT, K9).astype(jnp.bfloat16)
    bf_col = bf.reshape(C_FEAT, 1).astype(jnp.float32)
    n_pad = HEADS_PAD - C_EMB - C_LOGIT
    wh = jnp.concatenate(
        [we_t[:, :, 0, 0], wl_t[:, :, 0, 0],
         jnp.zeros((n_pad, C_FEAT), jnp.float32)], axis=0).astype(jnp.bfloat16)
    bh = jnp.concatenate(
        [be, bl, jnp.zeros((n_pad,), jnp.float32)]).reshape(HEADS_PAD, 1)
    bh = bh.astype(jnp.float32)

    # ---- tiling ----
    TH = _choose_tile_rows(H, W, N)
    TW = TH * W
    n_tiles = (H * W) // TW
    grid = (N, n_tiles)

    flops = 2 * N * H * W * (K9 * C_FEAT + C_FEAT * HEADS_PAD)
    bytes_accessed = (N * K9 * H * W * 2                        # im2col input (bf16)
                      + (wf.size + wh.size) * 2
                      + (bf_col.size + bh.size) * 4
                      + N * H * W * (C_EMB + C_LOGIT) * 4)      # outputs (f32)

    emb_flat, logit_flat = pl.pallas_call(
        lanenet_kernel,
        out_shape=(
            jax.ShapeDtypeStruct((N, C_EMB, H * W), jnp.float32),
            jax.ShapeDtypeStruct((N, C_LOGIT, H * W), jnp.float32),
        ),
        grid_spec=pltpu.PrefetchScalarGridSpec(
            num_scalar_prefetch=0,
            grid=grid,
            in_specs=[
                pl.BlockSpec((1, K9, TW), lambda n, t: (n, 0, t)),
                pl.BlockSpec((C_FEAT, K9), lambda n, t: (0, 0)),
                pl.BlockSpec((C_FEAT, 1), lambda n, t: (0, 0)),
                pl.BlockSpec((HEADS_PAD, C_FEAT), lambda n, t: (0, 0)),
                pl.BlockSpec((HEADS_PAD, 1), lambda n, t: (0, 0)),
            ],
            out_specs=[
                pl.BlockSpec((1, C_EMB, TW), lambda n, t: (n, 0, t)),
                pl.BlockSpec((1, C_LOGIT, TW), lambda n, t: (n, 0, t)),
            ],
        ),
        compiler_params=pltpu.CompilerParams(
            dimension_semantics=("parallel", "parallel"),
            vmem_limit_bytes=VMEM_LIMIT_BYTES),
        cost_estimate=pl.CostEstimate(
            flops=flops, transcendentals=0, bytes_accessed=bytes_accessed),
    )(x_col, wf, bf_col, wh, bh)

    # Free reshapes: kernel already emitted NCHW (channels-first, pixel-flattened).
    embedding = emb_flat.reshape(N, C_EMB, H, W)
    logit = logit_flat.reshape(N, C_LOGIT, H, W)
    return embedding, logit


def init_params(key, cin):
    """Deterministic synthetic parameters in PyTorch layouts."""
    k = jax.random.split(key, 6)
    # backbone 3x3 conv (stand-in for ENet(64)): torch weight (64, Cin, 3, 3)
    wf = jax.random.normal(k[0], (C_FEAT, cin, 3, 3), jnp.float32) * 0.1
    bf = jax.random.normal(k[1], (C_FEAT,), jnp.float32) * 0.01
    # conv_logit: nn.Conv2d(64, 2, 1, 1) -> weight (2, 64, 1, 1)
    wl = jax.random.normal(k[2], (C_LOGIT, C_FEAT, 1, 1), jnp.float32) * 0.1
    bl = jax.random.normal(k[3], (C_LOGIT,), jnp.float32) * 0.01
    # conv_embedding: nn.Conv2d(64, 3, 1, 1) -> weight (3, 64, 1, 1)
    we = jax.random.normal(k[4], (C_EMB, C_FEAT, 1, 1), jnp.float32) * 0.1
    be = jax.random.normal(k[5], (C_EMB,), jnp.float32) * 0.01
    return (wf, bf, wl, bl, we, be)


if __name__ == "__main__":
    key = jax.random.PRNGKey(0)
    kx, kp = jax.random.split(key)

    N, Cin, H, W = 2, 4, 16, 16
    x = jax.random.normal(kx, (N, Cin, H, W), jnp.float32)
    params = init_params(kp, Cin)

    embedding, logit = jax.jit(lanenet_forward)(x, params)
    jax.block_until_ready((embedding, logit))

    assert embedding.shape == (N, C_EMB, H, W), embedding.shape
    assert logit.shape == (N, C_LOGIT, H, W), logit.shape
    print("KERNEL_OK")
</pallas_src>

<mosaic_0001>
module attributes {stable_mosaic.version = 11 : i64} {
  func.func @lanenet_kernel(%arg0: i32, %arg1: i32, %arg2: memref<1x36x256xbf16, #tpu.memory_space<vmem>>, %arg3: memref<64x36xbf16, #tpu.memory_space<vmem>>, %arg4: memref<64x1xf32, #tpu.memory_space<vmem>>, %arg5: memref<8x64xbf16, #tpu.memory_space<vmem>>, %arg6: memref<8x1xf32, #tpu.memory_space<vmem>>, %arg7: memref<1x3x256xf32, #tpu.memory_space<vmem>>, %arg8: memref<1x2x256xf32, #tpu.memory_space<vmem>>) attributes {dimension_semantics = [#tpu.dimension_semantics<parallel>, #tpu.dimension_semantics<parallel>], iteration_bounds = array<i64: 2, 1>, scalar_prefetch = 0 : i64, scratch_operands = 0 : i64, tpu.core_type = #tpu.core_type<tc>, window_params = [{transform_indices = @transform_0, window_bounds = array<i64: 1, 36, 256>}, {pipeline_mode = #tpu.pipeline_mode<synchronous>, transform_indices = @transform_1, window_bounds = array<i64: 64, 36>}, {pipeline_mode = #tpu.pipeline_mode<synchronous>, transform_indices = @transform_2, window_bounds = array<i64: 64, 1>}, {pipeline_mode = #tpu.pipeline_mode<synchronous>, transform_indices = @transform_3, window_bounds = array<i64: 8, 64>}, {pipeline_mode = #tpu.pipeline_mode<synchronous>, transform_indices = @transform_4, window_bounds = array<i64: 8, 1>}, {transform_indices = @transform_5, window_bounds = array<i64: 1, 3, 256>}, {transform_indices = @transform_6, window_bounds = array<i64: 1, 2, 256>}]} {
    %c0 = arith.constant 0 : index
    %c0_0 = arith.constant 0 : index
    %c0_1 = arith.constant 0 : index
    %0 = vector.load %arg2[%c0, %c0_0, %c0_1] : memref<1x36x256xbf16, #tpu.memory_space<vmem>>, vector<1x36x256xbf16>
    %1 = vector.shape_cast %0 : vector<1x36x256xbf16> to vector<36x256xbf16>
    %c0_2 = arith.constant 0 : index
    %c0_3 = arith.constant 0 : index
    %2 = vector.load %arg3[%c0_2, %c0_3] : memref<64x36xbf16, #tpu.memory_space<vmem>>, vector<64x36xbf16>
    %cst = arith.constant dense<0.000000e+00> : vector<64x256xf32>
    %3 = tpu.matmul %2, %1, %cst {dimension_numbers = #tpu.dot_dimension_numbers<[1], [0], [0], [1], [0, 0, 1, 1], [], []>} : vector<64x36xbf16>, vector<36x256xbf16>, vector<64x256xf32> -> vector<64x256xf32>
    %c0_4 = arith.constant 0 : index
    %c0_5 = arith.constant 0 : index
    %4 = vector.load %arg4[%c0_4, %c0_5] : memref<64x1xf32, #tpu.memory_space<vmem>>, vector<64x1xf32>
    %5 = vector.broadcast %4 : vector<64x1xf32> to vector<64x256xf32>
    %6 = arith.addf %3, %5 : vector<64x256xf32>
    %cst_6 = arith.constant 0.000000e+00 : f32
    %7 = vector.broadcast %cst_6 : f32 to vector<64x256xf32>
    %8 = arith.maximumf %6, %7 : vector<64x256xf32>
    %c0_7 = arith.constant 0 : index
    %c0_8 = arith.constant 0 : index
    %9 = vector.load %arg5[%c0_7, %c0_8] : memref<8x64xbf16, #tpu.memory_space<vmem>>, vector<8x64xbf16>
    %10 = arith.truncf %8 : vector<64x256xf32> to vector<64x256xbf16>
    %cst_9 = arith.constant dense<0.000000e+00> : vector<8x256xf32>
    %11 = tpu.matmul %9, %10, %cst_9 {dimension_numbers = #tpu.dot_dimension_numbers<[1], [0], [0], [1], [0, 0, 1, 1], [], []>} : vector<8x64xbf16>, vector<64x256xbf16>, vector<8x256xf32> -> vector<8x256xf32>
    %c0_10 = arith.constant 0 : index
    %c0_11 = arith.constant 0 : index
    %12 = vector.load %arg6[%c0_10, %c0_11] : memref<8x1xf32, #tpu.memory_space<vmem>>, vector<8x1xf32>
    %13 = vector.broadcast %12 : vector<8x1xf32> to vector<8x256xf32>
    %14 = arith.addf %11, %13 : vector<8x256xf32>
    %15 = vector.extract_strided_slice %14 {offsets = [0, 0], sizes = [3, 256], strides = [1, 1]} : vector<8x256xf32> to vector<3x256xf32>
    %16 = vector.shape_cast %15 : vector<3x256xf32> to vector<1x3x256xf32>
    %c0_12 = arith.constant 0 : index
    %c0_13 = arith.constant 0 : index
    %c0_14 = arith.constant 0 : index
    %17 = vector.load %arg7[%c0_12, %c0_13, %c0_14] : memref<1x3x256xf32, #tpu.memory_space<vmem>>, vector<1x3x256xf32>
    tpu.vector_store %arg7[%c0_12, %c0_13, %c0_14], %16 {strides = array<i32>} : memref<1x3x256xf32, #tpu.memory_space<vmem>>, vector<1x3x256xf32>,
    %18 = vector.extract_strided_slice %14 {offsets = [3, 0], sizes = [2, 256], strides = [1, 1]} : vector<8x256xf32> to vector<2x256xf32>
    %19 = vector.shape_cast %18 : vector<2x256xf32> to vector<1x2x256xf32>
    %c0_15 = arith.constant 0 : index
    %c0_16 = arith.constant 0 : index
    %c0_17 = arith.constant 0 : index
    %20 = vector.load %arg8[%c0_15, %c0_16, %c0_17] : memref<1x2x256xf32, #tpu.memory_space<vmem>>, vector<1x2x256xf32>
    tpu.vector_store %arg8[%c0_15, %c0_16, %c0_17], %19 {strides = array<i32>} : memref<1x2x256xf32, #tpu.memory_space<vmem>>, vector<1x2x256xf32>,
    return
  }
  func.func @transform_0(%arg0: i32, %arg1: i32) -> (i32, i32, i32) {
    %c0_i32 = arith.constant 0 : i32
    %c0_i32_0 = arith.constant 0 : i32
    return %arg0, %c0_i32, %arg1 : i32, i32, i32
  }
  func.func @transform_1(%arg0: i32, %arg1: i32) -> (i32, i32) {
    %c0_i32 = arith.constant 0 : i32
    %c0_i32_0 = arith.constant 0 : i32
    %c0_i32_1 = arith.constant 0 : i32
    return %c0_i32, %c0_i32_0 : i32, i32
  }
  func.func @transform_2(%arg0: i32, %arg1: i32) -> (i32, i32) {
    %c0_i32 = arith.constant 0 : i32
    %c0_i32_0 = arith.constant 0 : i32
    %c0_i32_1 = arith.constant 0 : i32
    return %c0_i32, %c0_i32_0 : i32, i32
  }
  func.func @transform_3(%arg0: i32, %arg1: i32) -> (i32, i32) {
    %c0_i32 = arith.constant 0 : i32
    %c0_i32_0 = arith.constant 0 : i32
    %c0_i32_1 = arith.constant 0 : i32
    return %c0_i32, %c0_i32_0 : i32, i32
  }
  func.func @transform_4(%arg0: i32, %arg1: i32) -> (i32, i32) {
    %c0_i32 = arith.constant 0 : i32
    %c0_i32_0 = arith.constant 0 : i32
    %c0_i32_1 = arith.constant 0 : i32
    return %c0_i32, %c0_i32_0 : i32, i32
  }
  func.func @transform_5(%arg0: i32, %arg1: i32) -> (i32, i32, i32) {
    %c0_i32 = arith.constant 0 : i32
    %c0_i32_0 = arith.constant 0 : i32
    return %arg0, %c0_i32, %arg1 : i32, i32, i32
  }
  func.func @transform_6(%arg0: i32, %arg1: i32) -> (i32, i32, i32) {
    %c0_i32 = arith.constant 0 : i32
    %c0_i32_0 = arith.constant 0 : i32
    return %arg0, %c0_i32, %arg1 : i32, i32, i32
  }
}

</mosaic_0001>

<bundles_post_ra>
// kernel: lanenet_forward.1
= control target key start
LH: loop header
LB: loop body
LE: loop exit
PB: predicated region body
PF: predicated region fallthrough
CT: control target
= control target key end

     0   :  { %s895_s21 = smov 0   ;;  %s897_s22 = smov 0   ;;  %s978_s0 = inlined_call_operand.vmem [shape: bf16[2,36,256], index: 0, kind: input, shape index: {}]   ;;  %s979_s1 = inlined_call_operand.vmem [shape: bf16[64,36], index: 1, kind: input, shape index: {}]   ;;  %s980_s2 = inlined_call_operand.vmem [shape: f32[64,1], index: 2, kind: input, shape index: {}]   ;;  %s981_s3 = inlined_call_operand.vmem [shape: bf16[8,64], index: 3, kind: input, shape index: {}]   ;;  %s982_s4 = inlined_call_operand.vmem [shape: f32[8,1], index: 4, kind: input, shape index: {}]   ;;  %s983_s5 = inlined_call_operand.vmem [shape: f32[2,3,256], index: 5, kind: output, shape index: {0}]   ;;  %s984_s6 = inlined_call_operand.vmem [shape: f32[2,2,256], index: 6, kind: output, shape index: {1}]  }
   0x1   :  { %s899_s23 = smov 0  }
   0x2 LB: > { %s29_s24 = sadd.s32 1, %s852_s22  ;;  %p766_p0 = scmp.ge.s32.totalorder %s856_s23, 1  ;;  %s856_s23 = sphi %s899_s23, %s17_s23   ;;  %s852_s22 = sphi %s897_s22, %s986_s22   ;;  %s848_s21 = sphi %s895_s21, %s985_s21  }
   0x3   : > { %p31_p1 = scmp.ge.s32.totalorder %s29_s24, 2  ;;  %p238_p2 = scmp.lt.s32.totalorder %s856_s23, 3 }
   0x5   : > { %s988_s24 = smov (%p31_p1, %s29_s24), 0  ;;  %p239_p3 = pnand %p766_p0, %p238_p2 }
   0x6   : > { %p286_p4 = scmp.lt.s32.totalorder (!%p239_p3), %s848_s21, 1 }
   0x7   : > { %242 = sbr.rel (%p239_p3) target bundleno = 483 (0x1e3), region = 40 }
   0xc   : > { %v858_v0 = vmov 0   ;;  %s990_s21 = smov (!%p286_p4, %s848_s21), 1  ;;  %v335_v1 = vld [vmem:[%s980_s2 + $0x30] sm:$0xff]  ;;  %v333_v2 = vld [vmem:[%s980_s2 + $0x20] sm:$0xff]  ;;  %v336_v3 = vld [vmem:[%s980_s2 + $0x38] sm:$0xff]  ;;  %vm435_vm0 = vcmask 1041408  }
   0xd   : > { %474 = vmatprep.mubr.bf16.mxu0 %v858_v0  ;;  %820 = vset.pattern.permute.xlu0 %v858_v0  ;;  %s793_s25 = smul.u32 40, %s990_s21  ;;  %v334_v4 = vld [vmem:[%s980_s2 + $0x28] sm:$0xff]  ;;  %v331_v10 = vld [vmem:[%s980_s2 + $0x10] sm:$0xff]  ;;  %v332_v12 = vld [vmem:[%s980_s2 + $0x18] sm:$0xff]  ;;  %vm422_vm1 = vcmask 293888   ;;  %vm546_vm2 = vcmask 523264  }
   0xe   : > { %821 = vset.pattern.permute.xlu1 %v858_v0  ;;  %582 = vmatprep.mubr.bf16.mxu1 %v858_v0  ;;  %v329_v14 = vld [vmem:[%s980_s2] sm:$0xff]  ;;  %v330_v16 = vld [vmem:[%s980_s2 + $0x8] sm:$0xff]  ;;  %v832_v20 = vld [vmem:[%s979_s1 + $0x10] sm:$0xff]   ;;  %s791_s13 = sshll.u32 %s990_s21, 3  ;;  %vm612_vm3 = vcmask 1040384   ;;  %vm613_vm4 = vcmask 1042434  }
   0xf   : > { %369 = vperm.xlu0 %820, %v335_v1   ;;  %s293_s8 = scalar_lea.vmem %s978_s0, %s793_s25  ;;  %359 = vperm.xlu1 %821, %v333_v2   ;;  %v830_v17 = vld [vmem:[%s979_s1] sm:$0xff]   ;;  %v831_v19 = vld [vmem:[%s979_s1 + $0x8] sm:$0xff]   ;;  %v833_v21 = vld [vmem:[%s979_s1 + $0x18] sm:$0xff]   ;;  %s303_s16 = scalar_lea.vmem %s983_s5, %s791_s13  ;;  %vm615_vm6 = vcmask 1044484   ;;  %vm617_vm8 = vcmask 1046534  }
  0x10   : > { %v320_v5 = vld [vmem:[%s293_s8 + $0x20] sm:$0x33]  ;;  %v824_v8 = vld [vmem:[%s293_s8 + $0x14] ss:$8 sps:$4 sm:$0xff]   ;;  %v826_v11 = vld [vmem:[%s293_s8 + $0x10] ss:$8 sps:$4 sm:$0xff]  }
  0x11   : > { %v781_v6 = vcombine.high %v320_v5, %v320_v5  ;;  %v780_v7 = vcombine.low %v320_v5, %v320_v5  ;;  %v827_v13 = vld [vmem:[%s293_s8 + $0x4] ss:$8 sps:$4 sm:$0xff]   ;;  %v829_v15 = vld [vmem:[%s293_s8] ss:$8 sps:$4 sm:$0xff]   ;;  %vm614_vm5 = vmor %vm612_vm3, %vm613_vm4  ;;  %s792_s17 = sshll.u32 %s990_s21, 2 }
  0x12   : > { %v540_v18 = vld [vmem:[%s982_s4] sm:$0xff]  ;;  %vm616_vm7 = vmor %vm614_vm5, %vm615_vm6  ;;  %s313_s20 = scalar_lea.vmem %s984_s6, %s792_s17 }
  0x13   : > { %374 = vperm.xlu0 %820, %v336_v3   ;;  %782 = vmatprep.subr.msk.bf16.mxu0 %vm435_vm0, %v781_v6  ;;  %v437_v9 = vsel %vm435_vm0, %v780_v7, 0  ;;  %vm618_vm9 = vmor %vm616_vm7, %vm617_vm8 }
  0x14   : > { %364 = vperm.xlu1 %821, %v334_v4   ;;  %453 = vmatpush1.bf16.msra.mxu0 %v437_v9 }
  0x15   : > { %454 = vmatprep.subr.bf16.mxu0 %v824_v8 }
  0x17   : > { %349 = vperm.xlu0 %820, %v331_v10  }
  0x18   : > { %354 = vperm.xlu1 %821, %v332_v12   ;;  %455 = vmatpush1.bf16.msra.mxu0 %v826_v11 }
  0x19   : > { %456 = vmatprep.subr.bf16.mxu0 %v827_v13 }
  0x1b   : > { %339 = vperm.xlu0 %820, %v329_v14  }
  0x1c   : > { %344 = vperm.xlu1 %821, %v330_v16   ;;  %457 = vmatpush1.bf16.msra.mxu0 %v829_v15 }
  0x1f   : > { %543 = vperm.xlu0 %820, %v540_v18   ;;  %783 = vmatmul.mubr.msk.bf16.vlgmr.msra.gmra.mxu0 %vm422_vm1, %v830_v17 }
  0x20   : > { %484 = vmatprep.mubr.bf16.mxu0 %v858_v0 }
  0x27   : > { %784 = vmatmul.mubr.msk.bf16.gmra.mxu0 %vm422_vm1, %v831_v19 }
  0x28   : > { %494 = vmatprep.mubr.bf16.mxu0 %v858_v0 }
  0x2f   : > { %785 = vmatmul.mubr.msk.bf16.gmra.mxu0 %vm422_vm1, %v832_v20 }
  0x30   : > { %504 = vmatprep.mubr.bf16.mxu0 %v858_v0 }
  0x37   : > { %786 = vmatmul.mubr.msk.bf16.gmra.mxu0 %vm422_vm1, %v833_v21 }
  0x8a   : > { %v360_v31 = vpop.permute.xlu1 %359  ;;  %v370_v33 = vpop.permute.xlu0 %369 }
  0x8e   : > { %v375_v38 = vpop.permute.xlu0 %374 }
  0x8f   : > { %v365_v36 = vpop.permute.xlu1 %364 }
  0x92   : > { %v350_v49 = vpop.permute.xlu0 %349 }
  0x93   : > { %v355_v44 = vpop.permute.xlu1 %354 }
  0x96   : > { %v340_v4 = vpop.permute.xlu0 %339 }
  0x97   : > { %v345_v61 = vpop.permute.xlu1 %344 }
  0xdf   : > { %v476_v22 = vpop.f32.mrf.mxu0 }
  0xe0   : > { %v477_v14 = vadd.f32 %v476_v22, %v340_v4  ;;  %v859_v22 = vmov 1983009808  }
  0xe1   : > { %v478_v23 = vpop.f32.mrf.mxu0 }
  0xe2   : > { %v479_v7 = vadd.f32 %v478_v23, %v340_v4  ;;  %v515_v20 = vmax.f32 %v477_v14, 0.0  ;;  %v531_v23 = vld [vmem:[%s981_s3] sm:$0xf] }
  0xe3   : > { %v480_v24 = vpop.f32.mrf.mxu0 }
  0xe4   : > { %v481_v9 = vadd.f32 %v480_v24, %v345_v61  ;;  %v516_v16 = vmax.f32 %v479_v7, 0.0  ;;  %v598_v24 = vunpack.c.l.s4 %v859_v22 }
  0xe5   : > { %v482_v25 = vpop.f32.mrf.mxu0 }
  0xe6   : > { %v483_v1 = vadd.f32 %v482_v25, %v345_v61  ;;  %v517_v17 = vmax.f32 %v481_v9, 0.0  ;;  %v600_v25 = vlaneseq }
  0xe7   : > { %v486_v26 = vpop.f32.mrf.mxu0 }
  0xe8   : > { %v487_v5 = vadd.f32 %v486_v26, %v350_v49  ;;  %v518_v12 = vmax.f32 %v483_v1, 0.0  ;;  %v532_v21 = vpack.c.bf16 %v517_v17, %v515_v20  ;;  %v599_v26 = vunpack.c.0.s8 %v598_v24 }
  0xe9   : > { %v488_v27 = vpop.f32.mrf.mxu0 }
  0xea   : > { %v489_v58 = vadd.f32 %v488_v27, %v350_v49  ;;  %v519_v15 = vmax.f32 %v487_v5, 0.0  ;;  %v533_v19 = vpack.c.bf16 %v518_v12, %v516_v16  ;;  %v601_v27 = vshrl.u32 %v600_v25, 7 }
  0xeb   : > { %v490_v28 = vpop.f32.mrf.mxu0 }
  0xec   : > { %v491_v62 = vadd.f32 %v490_v28, %v355_v44  ;;  %v520_v8 = vmax.f32 %v489_v58, 0.0 }
  0xed   : > { %v492_v29 = vpop.f32.mrf.mxu0 }
  0xee   : > { %v493_v52 = vadd.f32 %v492_v29, %v355_v44  ;;  %v521_v10 = vmax.f32 %v491_v62, 0.0  ;;  %v544_v29 = vpop.permute.xlu0 %543 }
  0xef   : > { %v496_v30 = vpop.f32.mrf.mxu0 }
  0xf0   : > { %v497_v56 = vadd.f32 %v496_v30, %v360_v31  ;;  %v522_v2 = vmax.f32 %v493_v52, 0.0  ;;  %v534_v18 = vpack.c.bf16 %v521_v10, %v519_v15 }
  0xf1   : > { %v498_v32 = vpop.f32.mrf.mxu0 }
  0xf2   : > { %v499_v47 = vadd.f32 %v498_v32, %v360_v31  ;;  %v523_v6 = vmax.f32 %v497_v56, 0.0  ;;  %v535_v13 = vpack.c.bf16 %v522_v2, %v520_v8 }
  0xf3   : > { %v500_v34 = vpop.f32.mrf.mxu0 }
  0xf4   : > { %v501_v50 = vadd.f32 %v500_v34, %v365_v36  ;;  %v524_v59 = vmax.f32 %v499_v47, 0.0 }
  0xf5   : > { %v502_v35 = vpop.f32.mrf.mxu0 }
  0xf6   : > { %v503_v41 = vadd.f32 %v502_v35, %v365_v36  ;;  %v525_v63 = vmax.f32 %v501_v50, 0.0 }
  0xf7   : > { %v506_v37 = vpop.f32.mrf.mxu0 }
  0xf8   : > { %v507_v45 = vadd.f32 %v506_v37, %v370_v33  ;;  %v526_v53 = vmax.f32 %v503_v41, 0.0  ;;  %v536_v11 = vpack.c.bf16 %v525_v63, %v523_v6 }
  0xf9   : > { %v508_v39 = vpop.f32.mrf.mxu0 }
  0xfa   : > { %v509_v42 = vadd.f32 %v508_v39, %v370_v33  ;;  %v527_v57 = vmax.f32 %v507_v45, 0.0  ;;  %v537_v3 = vpack.c.bf16 %v526_v53, %v524_v59  ;;  %v602_v33 = vsub.s32 %v599_v26, %v601_v27 }
  0xfb   : > { %v510_v40 = vpop.f32.mrf.mxu0 }
  0xfc   : > { %v511_v43 = vadd.f32 %v510_v40, %v375_v38  ;;  %v528_v54 = vmax.f32 %v509_v42, 0.0 }
  0xfd   : > { %v512_v46 = vpop.f32.mrf.mxu0 }
  0xfe   : > { %v513_v48 = vadd.f32 %v512_v46, %v375_v38  ;;  %v529_v51 = vmax.f32 %v511_v43, 0.0 }
 0x100   : > { %v530_v55 = vmax.f32 %v513_v48, 0.0  ;;  %v538_v0 = vpack.c.bf16 %v529_v51, %v527_v57 }
 0x102   : > { %v539_v60 = vpack.c.bf16 %v530_v55, %v528_v54 }
 0x104   : > { %558 = vmatprep.subr.bf16.mxu1 %v539_v60 }
 0x105   : > { %559 = vmatpush1.bf16.msra.mxu1 %v538_v0 }
 0x106   : > { %560 = vmatprep.subr.bf16.mxu1 %v537_v3 }
 0x109   : > { %561 = vmatpush1.bf16.msra.mxu1 %v536_v11 }
 0x10a   : > { %562 = vmatprep.subr.bf16.mxu1 %v535_v13 }
 0x10d   : > { %563 = vmatpush1.bf16.msra.mxu1 %v534_v18 }
 0x10e   : > { %564 = vmatprep.subr.bf16.mxu1 %v533_v19 }
 0x111   : > { %565 = vmatpush1.bf16.msra.mxu1 %v532_v21 }
 0x114   : > { %787 = vmatmul.mubr.msk.bf16.vlgmr.msra.gmra.mxu1 %vm546_vm2, %v531_v23 }
 0x1d4   : > { %v584_v28 = vpop.f32.mrf.mxu1 }
 0x1d5   : > { %v585_v31 = vadd.f32 %v584_v28, %v544_v29 }
 0x1d6   : > { %v586_v30 = vpop.f32.mrf.mxu1 }
 0x1d7   : > { %v587_v32 = vadd.f32 %v586_v30, %v544_v29 }
 0x1d8   : > { %v588_v34 = vpop.f32.mrf.mxu1 }
 0x1d9   : > { %v593_v35 = vcombine.low %v585_v31, %v587_v32  ;;  %v596_v36 = vcombine.high %v585_v31, %v587_v32 }
 0x1da   : > { %v589_v37 = vpop.f32.mrf.mxu1 }
 0x1db   : > { %595 = vst [vmem:[%s303_s16] sm:$0x77] %v593_v35  ;;  %v603_v38 = vrot.slane %v593_v35, %v602_v33  ;;  %v610_v39 = vrot.slane %v596_v36, %v602_v33 }
 0x1dd   : > { %v611_v40 = vcombine.high %v603_v38, %v603_v38  ;;  %v621_v42 = vrot.slane %v610_v39, 7 }
 0x1df   : > { %v788_v41 = vrot.slane %v611_v40, 9 }
 0x1e1   : > { %v622_v43 = vsel %vm618_vm9, %v788_v41, %v621_v42 }
 0x1e2   : > { %624 = vst [vmem:[%s313_s20] sm:$0xf] %v622_v43 }
 0x1e3 PF: > { %s17_s23 = sadd.s32 1, %s856_s23   ;;  %s985_s21 = smov %s852_s22 }
 0x1e4   : > { %p14_p5 = scmp.ge.s32.totalorder %s17_s23, 4   ;;  %s986_s22 = smov %s988_s24 }
 0x1e6   :  { %16 = sbr.rel (!%p14_p5) target bundleno = 2 (0x2), region = 82 }

</bundles_post_ra>
